<compile_context>
chip_gen: v6e
topology: v6e:2x2x1
jax: 0.10.0
libtpu: 0.0.40
codegen_flags: <defaults>
</compile_context>

<pallas_src>
import functools

import jax
import jax.numpy as jnp
from jax.experimental import pallas as pl
from jax.experimental.pallas import tpu as pltpu

_EPS = 1e-10
_LANES = 128
_TARGET_BLOCK_BYTES = 2 * 1024 * 1024   # ~2 MiB per input block (review: size by bytes)
_VMEM_LIMIT_BYTES = 32 * 1024 * 1024    # 2 in-flight blocks + f32 temps << 32 MiB


def _round_up(a, m):
    return ((a + m - 1) // m) * m


def _round_down(a, m):
    return (a // m) * m


@functools.lru_cache(maxsize=1)
def _tensorcore_count():
    """Best-effort TensorCores-per-chip (v7x: 2, v5e/v6e: 1)."""
    try:
        info = pltpu.get_tpu_info()
        for attr in ("num_cores", "core_count", "num_tensorcores", "tensorcores_per_chip"):
            v = getattr(info, attr, None)
            if isinstance(v, int) and v >= 1:
                return v
    except Exception:
        pass
    try:
        v = getattr(jax.devices()[0], "num_cores", None)
        if isinstance(v, int) and v >= 1:
            return v
    except Exception:
        pass
    # Unknown: default to 2 so dual-core chips are never serialized; a spurious split on
    # a single-core chip costs at most one duplicated (fully masked) block.
    return 2


def _hloss_partial_kernel(x_ref, o_ref, *, steps, tile_rows, valid_rows):
    """Accumulate sum(x * log(x + eps)) of this split's blocks into an (8, 128) slab.

    Grid = (num_splits, steps); axis 1 is the resident-accumulator reduction axis.
    Rows at/after `valid_rows` (ragged last block, or whole duplicated blocks from the
    clamped index_map) are masked to 0 BEFORE the log, so they contribute exactly 0
    (0 * log(eps) == 0) — identical numerics to the old zero-padding, without the copy.
    """
    j = pl.program_id(1)

    @pl.when(j == 0)
    def _():
        o_ref[...] = jnp.zeros_like(o_ref)

    blk = pl.program_id(0) * steps + j                       # un-clamped logical block id
    row0 = blk * tile_rows                                   # first global row of block
    local = jax.lax.broadcasted_iota(jnp.int32, (tile_rows, 1), 0)
    in_bounds = (row0 + local) < valid_rows                  # (tile_rows, 1) row mask

    x = jnp.where(in_bounds, x_ref[...].astype(jnp.float32), 0.0)
    t = x * jnp.log(x + _EPS)                                # sign & 1/n folded in epilogue
    # (tile_rows, 128) -> (tile_rows//8, 8, 128): vreg-aligned row blocks summed with
    # plain VPU adds; the single cross-lane reduce happens once, outside the kernel.
    o_ref[...] += t.reshape(-1, 8, _LANES).sum(axis=0)


def hloss(x, *, block_bytes=_TARGET_BLOCK_BYTES, splits=None):
    """HLoss.forward: mean(-x * log(x + 1e-10)) over all elements (Pallas TPU)."""
    n = x.size
    if n == 0:
        return jnp.asarray(jnp.nan, jnp.float32)  # torch .mean() of empty -> nan

    # Stream 32-bit and 16-bit floats natively; anything else is pre-cast to f32.
    if not (x.dtype == jnp.float32
            or (jnp.issubdtype(x.dtype, jnp.floating) and x.dtype.itemsize == 2)):
        x = x.astype(jnp.float32)

    flat = x.reshape(-1)
    itemsize = x.dtype.itemsize
    pack = 32 // itemsize                 # sublane packing: 8 rows (f32) / 16 rows (16-bit)

    n_main = _round_down(n, _LANES)       # lane-aligned prefix length
    rows = n_main // _LANES

    if rows < pack:
        # Too small to form one aligned block; a kernel launch would be pure overhead.
        xf = flat.astype(jnp.float32)
        return -jnp.sum(xf * jnp.log(xf + _EPS)) / n

    if n_main == n:
        x2d = flat.reshape(rows, _LANES)  # zero-copy reshape: no pad, no slice
        tail_sum = jnp.float32(0.0)
    else:
        # Rare lane-unaligned case: prefix slice (may copy once, still cheaper than the
        # old pad-to-tile copy); the <128-element tail is summed in plain XLA.
        x2d = flat[:n_main].reshape(rows, _LANES)
        tailf = flat[n_main:].astype(jnp.float32)
        tail_sum = jnp.sum(tailf * jnp.log(tailf + _EPS))

    # Block rows sized by bytes (~block_bytes per block), multiple of packing, and never
    # larger than the array (ragged coverage is handled by in-kernel masking instead).
    max_rows = max(pack, _round_down(block_bytes // (_LANES * itemsize), pack))
    tile_rows = min(max_rows, _round_down(rows, pack))
    num_blocks = pl.cdiv(rows, tile_rows)

    if splits is None:
        splits = 2 if (num_blocks >= 2 and _tensorcore_count() >= 2) else 1
    num_splits = max(1, min(splits, num_blocks))
    steps = pl.cdiv(num_blocks, num_splits)
    last_blk = num_blocks - 1

    kernel = functools.partial(_hloss_partial_kernel, steps=steps,
                               tile_rows=tile_rows, valid_rows=rows)

    partials = pl.pallas_call(
        kernel,
        out_shape=jax.ShapeDtypeStruct((num_splits * 8, _LANES), jnp.float32),
        grid_spec=pltpu.PrefetchScalarGridSpec(
            num_scalar_prefetch=0,
            grid=(num_splits, steps),
            in_specs=[pl.BlockSpec(
                (tile_rows, _LANES),
                # Clamp so the (<=1) surplus block of the split re-reads the last valid
                # block instead of running off the array; the kernel masks it to zero.
                lambda i, j: (jnp.minimum(i * steps + j, last_blk), 0))],
            out_specs=pl.BlockSpec((8, _LANES), lambda i, j: (i, 0)),
        ),
        compiler_params=pltpu.CompilerParams(
            dimension_semantics=("parallel", "arbitrary"),
            vmem_limit_bytes=_VMEM_LIMIT_BYTES),
        # NOTE: if xprof shows exposed DMA on v7x, add pipeline_mode=pl.Buffered(3) to
        # the input BlockSpec (review item; not applied blind).
    )(x2d)

    # Epilogue: one cross-lane/sublane reduce + fused (-1/n) scale.
    return -(jnp.sum(partials) + tail_sum) / n


def hloss_ref(x):
    xf = x.astype(jnp.float32)
    return jnp.mean(-xf * jnp.log(xf + _EPS))


def my_new_partial_ce_loss(pred, target):
    """-(log(pred[:, 1] + eps) * target).sum() / (target.sum() + eps)."""
    p1 = pred[:, 1, :, :].astype(jnp.float32)
    t = target.astype(jnp.float32)
    return -jnp.sum(jnp.log(p1 + _EPS) * t) / (jnp.sum(t) + _EPS)


def _cross_entropy_nchw(logits, labels):
    """F.cross_entropy(logits (N,C,H,W), labels (N,H,W)) with mean reduction."""
    lg = logits.astype(jnp.float32)
    lse = jax.nn.logsumexp(lg, axis=1)                                      # (N, H, W)
    picked = jnp.take_along_axis(lg, labels[:, None, :, :], axis=1)[:, 0]   # (N, H, W)
    return jnp.mean(lse - picked)


def my_loss_single(outputF, outputW, labelF, labelW):
    """MyLossSingle.forward -> (ce_loss_f, partial_ce_loss_w, entropy_loss)."""
    # TODO(synk): ce_loss_f, the channel softmax and partial_ce_loss_w are thin XLA ops
    # over a tiny channel dim; only the HBM-heavy entropy term uses the Pallas kernel.
    ce_loss_f = _cross_entropy_nchw(outputF, labelF)
    predW = jax.nn.softmax(outputW.astype(jnp.float32), axis=1)  # == log_softmax(.).exp()
    partial_ce_loss_w = my_new_partial_ce_loss(predW, labelW)
    # NOTE: the original calls self.entropy(predW, dim=0), which is invalid PyTorch
    # (HLoss.forward takes a single argument); we implement the intended HLoss(predW).
    entropy_loss = hloss(predW)
    return ce_loss_f, partial_ce_loss_w, entropy_loss


if __name__ == "__main__":
    key = jax.random.PRNGKey(0)
    k1, k2, k3, k4 = jax.random.split(key, 4)

    N, C, H, W = 2, 4, 16, 16
    outputF = jax.random.normal(k1, (N, C, H, W), dtype=jnp.float32)
    outputW = jax.random.normal(k2, (N, C, H, W), dtype=jnp.float32)
    labelF = jax.random.randint(k3, (N, H, W), 0, C, dtype=jnp.int32)
    labelW = (jax.random.uniform(k4, (N, H, W)) > 0.5).astype(jnp.float32)

    ce, pce, ent = jax.block_until_ready(my_loss_single(outputF, outputW, labelF, labelW))

    predW = jax.nn.softmax(outputW, axis=1)
    ent_ref = hloss_ref(predW)
    assert jnp.allclose(ent, ent_ref, rtol=1e-5, atol=1e-6), (ent, ent_ref)
    assert bool(jnp.isfinite(ce)) and bool(jnp.isfinite(pce)), (ce, pce)

    # Lane-unaligned input: exercises the sub-128 tail epilogue + in-kernel row masking.
    x_odd = jax.random.uniform(jax.random.PRNGKey(1), (3, 5, 7, 11), dtype=jnp.float32)
    out_odd = jax.block_until_ready(hloss(x_odd))
    assert jnp.allclose(out_odd, hloss_ref(x_odd), rtol=1e-5, atol=1e-6), (out_odd, hloss_ref(x_odd))

    # Multi-block + forced 2-way split with an odd block count: exercises the clamped
    # duplicate block and the ragged (masked) last block without a huge array.
    x_mid = jax.random.uniform(jax.random.PRNGKey(2), (2, 4, 64, 83), dtype=jnp.float32)
    out_mid = jax.block_until_ready(hloss(x_mid, block_bytes=64 * 1024, splits=2))
    assert jnp.allclose(out_mid, hloss_ref(x_mid), rtol=1e-5, atol=1e-6), (out_mid, hloss_ref(x_mid))

    # 16-bit floats stream natively (no host-side pre-cast).
    for dt in (jnp.bfloat16, jnp.float16):
        x16 = predW.astype(dt)
        out16 = jax.block_until_ready(hloss(x16))
        ref16 = hloss_ref(x16)
        assert jnp.allclose(out16, ref16, rtol=1e-5, atol=1e-6), (dt, out16, ref16)

    print("KERNEL_OK")
</pallas_src>

<mosaic_0001>
module attributes {stable_mosaic.version = 11 : i64} {
  func.func @_hloss_partial_kernel(%arg0: i32, %arg1: i32, %arg2: memref<16x128xf32, #tpu.memory_space<vmem>>, %arg3: memref<8x128xf32, #tpu.memory_space<vmem>>) attributes {dimension_semantics = [#tpu.dimension_semantics<parallel>, #tpu.dimension_semantics<arbitrary>], iteration_bounds = array<i64: 1, 1>, scalar_prefetch = 0 : i64, scratch_operands = 0 : i64, tpu.core_type = #tpu.core_type<tc>, window_params = [{transform_indices = @transform_0, window_bounds = array<i64: 16, 128>}, {transform_indices = @transform_1, window_bounds = array<i64: 8, 128>}]} {
    %c0_i32 = arith.constant 0 : i32
    %0 = arith.cmpi eq, %arg1, %c0_i32 : i32
    %1 = arith.extui %0 : i1 to i32
    %c0_i32_0 = arith.constant 0 : i32
    %2 = arith.cmpi ne, %1, %c0_i32_0 : i32
    scf.if %2 {
      %cst_9 = arith.constant 0.000000e+00 : f32
      %25 = vector.broadcast %cst_9 : f32 to vector<8x128xf32>
      %c0_10 = arith.constant 0 : index
      %c0_11 = arith.constant 0 : index
      %26 = vector.load %arg3[%c0_10, %c0_11] : memref<8x128xf32, #tpu.memory_space<vmem>>, vector<8x128xf32>
      tpu.vector_store %arg3[%c0_10, %c0_11], %25 {strides = array<i32>} : memref<8x128xf32, #tpu.memory_space<vmem>>, vector<8x128xf32>,
    } else {
    }
    %c1_i32 = arith.constant 1 : i32
    %3 = arith.muli %arg0, %c1_i32 : i32
    %4 = arith.addi %3, %arg1 : i32
    %c16_i32 = arith.constant 16 : i32
    %5 = arith.muli %4, %c16_i32 : i32
    %6 = tpu.iota {dimensions = array<i32: 0>} : vector<16x1xi32>
    %7 = vector.broadcast %5 : i32 to vector<16x1xi32>
    %8 = arith.addi %7, %6 : vector<16x1xi32>
    %c16_i32_1 = arith.constant 16 : i32
    %9 = vector.broadcast %c16_i32_1 : i32 to vector<16x1xi32>
    %10 = arith.cmpi slt, %8, %9 : vector<16x1xi32>
    %c0 = arith.constant 0 : index
    %c0_2 = arith.constant 0 : index
    %11 = vector.load %arg2[%c0, %c0_2] : memref<16x128xf32, #tpu.memory_space<vmem>>, vector<16x128xf32>
    %cst = arith.constant 0.000000e+00 : f32
    %12 = vector.shape_cast %10 : vector<16x1xi1> to vector<16x1xi1>
    %13 = vector.broadcast %12 : vector<16x1xi1> to vector<16x128xi1>
    %14 = vector.broadcast %cst : f32 to vector<16x128xf32>
    %15 = arith.select %13, %11, %14 : vector<16x128xi1>, vector<16x128xf32>
    %cst_3 = arith.constant 1.000000e-10 : f32
    %16 = vector.broadcast %cst_3 : f32 to vector<16x128xf32>
    %17 = arith.addf %15, %16 : vector<16x128xf32>
    %18 = math.log %17 : vector<16x128xf32>
    %19 = arith.mulf %15, %18 : vector<16x128xf32>
    %c0_4 = arith.constant 0 : index
    %c0_5 = arith.constant 0 : index
    %20 = vector.load %arg3[%c0_4, %c0_5] : memref<8x128xf32, #tpu.memory_space<vmem>>, vector<8x128xf32>
    %21 = vector.shape_cast %19 : vector<16x128xf32> to vector<2x8x128xf32>
    %cst_6 = arith.constant dense<0.000000e+00> : vector<8x128xf32>
    %22 = vector.multi_reduction <add>, %21, %cst_6 [0] : vector<2x8x128xf32> to vector<8x128xf32>
    %23 = arith.addf %20, %22 : vector<8x128xf32>
    %c0_7 = arith.constant 0 : index
    %c0_8 = arith.constant 0 : index
    %24 = vector.load %arg3[%c0_7, %c0_8] : memref<8x128xf32, #tpu.memory_space<vmem>>, vector<8x128xf32>
    tpu.vector_store %arg3[%c0_7, %c0_8], %23 {strides = array<i32>} : memref<8x128xf32, #tpu.memory_space<vmem>>, vector<8x128xf32>,
    return
  }
  func.func @transform_0(%arg0: i32, %arg1: i32) -> (i32, i32) {
    %c1_i32 = arith.constant 1 : i32
    %0 = arith.muli %arg0, %c1_i32 : i32
    %1 = arith.addi %0, %arg1 : i32
    %c0_i32 = arith.constant 0 : i32
    %2 = arith.minsi %1, %c0_i32 : i32
    %c0_i32_0 = arith.constant 0 : i32
    %c0_i32_1 = arith.constant 0 : i32
    return %2, %c0_i32_0 : i32, i32
  }
  func.func @transform_1(%arg0: i32, %arg1: i32) -> (i32, i32) {
    %c0_i32 = arith.constant 0 : i32
    %c0_i32_0 = arith.constant 0 : i32
    return %arg0, %c0_i32 : i32, i32
  }
}

</mosaic_0001>

<bundles_post_ra>
// kernel: tpu_custom_call.1
= control target key start
LH: loop header
LB: loop body
LE: loop exit
PB: predicated region body
PF: predicated region fallthrough
CT: control target
= control target key end

     0   :  { %6 = vsyncpa [#allocation3], 0  ;;  %s158_s0 = inlined_call_operand.hbm [shape: f32[16,128], index: 0, kind: input, shape index: {}]   ;;  %s159_s1 = inlined_call_operand.hbm [shape: f32[8,128], index: 1, kind: output, shape index: {}]  }
   0x1   :  { %7 = vsyncpa [#allocation4], 0  ;;  %s138_s6 = smov [#allocation2]  }
   0x2   :  { %s19_s7 = sshll.u32 %s138_s6, 4  ;;  %s20_s7 = int_to_ptr.vmem [resolvable:$true] %s19_s7 }
   0x3   :  { %s102_s8 = scalar_lea.vmem %s20_s7, 256  ;;  %p107_p1 = scmp.lt.s32.totalorder %s20_s7, %s20_s7 }
   0x4   :  { %p103_p0 = scmp.ne.s32.totalorder %s20_s7, %s102_s8  ;;  %p108_p2 = scmp.lt.s32.totalorder %s102_s8, %s102_s8 }
   0x6   :  { %p109_p3 = por %p108_p2, %p107_p1 }
   0x8   :  { %p110_p4 = pnand %p109_p3, %p103_p0 }
   0xa   :  { %113 = shalt.err (!%p110_p4)
}
   0xb   :  { %s139_s9 = smov 128   ;;  %s140_s10 = smov 8  }
   0xc   :  { %25 = dma.hbm_to_vmem [thread:$0]  %s158_s0, 256, %s20_s7, [#allocation3], %s139_s9, %s139_s9, %s140_s10  }
   0xd   :  { %134 = dma.done.wait [#allocation3], 256  }
   0xe   :  { %135 = vsyncadd [#allocation3], 4294967040  ;;  %v48_v0 = vld [vmem:[#allocation2] sm:$0xff]  ;;  %v49_v1 = vld [vmem:[#allocation2 + $0x8] sm:$0xff]  ;;  %s141_s13 = smov [#allocation5]  }
   0xf   :  { %v56_v2 = vadd.f32 1e-10, %v48_v0  ;;  %v57_v3 = vadd.f32 1e-10, %v49_v1  ;;  %s74_s14 = sshll.u32 %s141_s13, 4  ;;  %s75_s14 = int_to_ptr.vmem [resolvable:$true] %s74_s14 }
  0x10   :  { %s114_s0 = scalar_lea.vmem %s75_s14, 128  ;;  %p119_p6 = scmp.lt.s32.totalorder %s75_s14, %s75_s14 }
  0x11   :  { %90 = vlog2.f32 %v56_v2  ;;  %p115_p5 = scmp.ne.s32.totalorder %s75_s14, %s114_s0  ;;  %p120_p7 = scmp.lt.s32.totalorder %s114_s0, %s114_s0 }
  0x12   :  { %92 = vlog2.f32 %v57_v3 }
  0x13   :  { %p121_p8 = por %p120_p7, %p119_p6 }
  0x15   :  { %p122_p9 = pnand %p121_p8, %p115_p5 }
  0x1e   :  { %v91_v4 = vpop.eup %90 }
  0x1f   :  { %v93_v5 = vpop.eup %92  ;;  %v59_v6 = vmul.f32 0.6931472, %v91_v4 }
  0x20   :  { %v61_v7 = vmul.f32 0.6931472, %v93_v5 }
  0x21   :  { %v62_v8 = vmul.f32 %v59_v6, %v48_v0 }
  0x22   :  { %v63_v9 = vmul.f32 %v61_v7, %v49_v1 }
  0x24   :  { %v65_v10 = vadd.f32 %v63_v9, %v62_v8 }
  0x26   :  { %67 = vst [vmem:[#allocation5] sm:$0xff] %v65_v10 }
  0x27   :  { %125 = shalt.err (!%p122_p9)
}
  0x28   :  { %77 = dma.vmem_to_hbm [thread:$0]  %s75_s14, 128, %s159_s1, [#allocation4]  }
  0x29   :  { %136 = dma.done.wait [#allocation4], 128  }
  0x2a   :  { %137 = vsyncadd [#allocation4], 4294967168 }
  0x2b   :  { %81 = vsyncpa [#allocation3], 1 }
  0x2c   :  { %82 = vsyncpa [#allocation4], 1 }

</bundles_post_ra>
